<compile_context>
chip_gen: v7x
topology: tpu7x:2x2x1
jax: 0.10.0
libtpu: 0.0.40
codegen_flags: <defaults>
</compile_context>

<pallas_src>
import jax
import jax.numpy as jnp
from jax.experimental import pallas as pl
from jax.experimental.pallas import tpu as pltpu


# --------------------------- single-cell kernel ---------------------------

def rnn_cell_kernel(x_ref, h_ref, wih_ref, whh_ref, b_ref, o_ref):
    # Two MXU matmuls (f32 accumulate) + bias broadcast (VPU) + tanh (EUP),
    # all operands resident in VMEM as whole-array blocks.
    acc = jnp.dot(x_ref[...], wih_ref[...], preferred_element_type=jnp.float32)
    acc = acc + jnp.dot(h_ref[...], whh_ref[...], preferred_element_type=jnp.float32)
    o_ref[...] = jnp.tanh(acc + b_ref[...]).astype(o_ref.dtype)


@jax.jit
def rnn_cell_forward(x, hidden, w_ih_t, w_hh_t, bias):
    """One cell step. x: [B, I], hidden: [B, H], w_ih_t: [I, H], w_hh_t: [H, H], bias: [1, H]."""
    B, I = x.shape
    H = hidden.shape[1]

    flops = 2 * B * I * H + 2 * B * H * H + 2 * B * H
    bytes_accessed = 4 * (B * I + B * H + I * H + H * H + H + B * H)

    vmem = pl.BlockSpec(memory_space=pltpu.MemorySpace.VMEM)
    return pl.pallas_call(
        rnn_cell_kernel,
        out_shape=jax.ShapeDtypeStruct((B, H), x.dtype),
        in_specs=[vmem, vmem, vmem, vmem, vmem],
        out_specs=vmem,
        # h_new can reuse hidden's HBM buffer when the caller donates it (free when
        # chaining cells); harmless (XLA copies) when the caller keeps hidden alive.
        input_output_aliases={1: 0},
        cost_estimate=pl.CostEstimate(
            flops=flops, transcendentals=B * H, bytes_accessed=bytes_accessed),
    )(x, hidden, w_ih_t, w_hh_t, bias)


# ------------------------- fused sequence kernel --------------------------

def rnn_seq_kernel(x_ref, h0_ref, wih_ref, whh_ref, b_ref, o_ref, h_scr):
    t = pl.program_id(0)

    @pl.when(t == 0)
    def _init():
        h_scr[...] = h0_ref[...].astype(jnp.float32)

    x_t = x_ref[0]                                   # (B, I) slice of the (1, B, I) block
    acc = jnp.dot(x_t, wih_ref[...], preferred_element_type=jnp.float32)
    acc = acc + jnp.dot(h_scr[...], whh_ref[...], preferred_element_type=jnp.float32)
    h_new = jnp.tanh(acc + b_ref[...])
    h_scr[...] = h_new                               # carry to next grid step
    o_ref[0] = h_new.astype(o_ref.dtype)


@jax.jit
def rnn_sequence_forward(xs, h0, w_ih_t, w_hh_t, bias):
    """Apply the cell over a whole sequence in ONE pallas_call.

    xs: [T, B, I], h0: [B, H] -> returns all hidden states [T, B, H].
    Weights/bias are loaded into VMEM once (constant index_maps); hidden is carried
    in a VMEM scratch across the sequential (arbitrary) time axis.
    """
    T, B, I = xs.shape
    H = h0.shape[1]

    flops = T * (2 * B * I * H + 2 * B * H * H + 2 * B * H)
    # Weights/bias counted once per sequence (resident), activations per step.
    bytes_accessed = 4 * (T * B * I + T * B * H + I * H + H * H + H + B * H)

    grid_spec = pltpu.PrefetchScalarGridSpec(
        num_scalar_prefetch=0,
        grid=(T,),
        in_specs=[
            pl.BlockSpec((1, B, I), lambda t: (t, 0, 0)),   # x_t: new block per step
            pl.BlockSpec((B, H), lambda t: (0, 0)),          # h0: loaded once
            pl.BlockSpec((I, H), lambda t: (0, 0)),          # W_ih^T: resident
            pl.BlockSpec((H, H), lambda t: (0, 0)),          # W_hh^T: resident
            pl.BlockSpec((1, H), lambda t: (0, 0)),          # bias: resident
        ],
        out_specs=pl.BlockSpec((1, B, H), lambda t: (t, 0, 0)),
        scratch_shapes=[pltpu.VMEM((B, H), jnp.float32)],    # hidden-state carry
    )
    return pl.pallas_call(
        rnn_seq_kernel,
        out_shape=jax.ShapeDtypeStruct((T, B, H), xs.dtype),
        grid_spec=grid_spec,
        compiler_params=pltpu.CompilerParams(
            dimension_semantics=("arbitrary",)),             # time axis is sequential
        cost_estimate=pl.CostEstimate(
            flops=flops, transcendentals=T * B * H, bytes_accessed=bytes_accessed),
    )(xs, h0, w_ih_t, w_hh_t, bias)


# ------------------------------ parameters --------------------------------

def init_rnn_cell_params(key, input_size, hidden_size, dtype=jnp.float32):
    """Mirror of RNNCell.__init__: two Linear(bias=False) weights + a single zero bias.

    Weights are stored pre-transposed (K, H) so the forward pass never pays for a
    per-call transpose. Original-layout weights are returned too (for reference math).
    """
    kwi, kwh = jax.random.split(key)
    bound_ih = 1.0 / jnp.sqrt(input_size)
    bound_hh = 1.0 / jnp.sqrt(hidden_size)
    w_ih = jax.random.uniform(kwi, (hidden_size, input_size), dtype=dtype,
                              minval=-bound_ih, maxval=bound_ih)
    w_hh = jax.random.uniform(kwh, (hidden_size, hidden_size), dtype=dtype,
                              minval=-bound_hh, maxval=bound_hh)
    bias = jnp.zeros((1, hidden_size), dtype=dtype)
    params = {
        "w_ih_t": jnp.asarray(w_ih.T),  # (I, H): transposed exactly once, here
        "w_hh_t": jnp.asarray(w_hh.T),  # (H, H)
        "bias": bias,                   # (1, H)
    }
    return params, (w_ih, w_hh, bias)


# ---------------------------------- demo -----------------------------------

if __name__ == "__main__":
    # Small, TPU-friendly shapes: batch=8, input_size=64, hidden_size=128, seq=16.
    B, INPUT_SIZE, HIDDEN_SIZE, T = 8, 64, 128, 16

    key = jax.random.PRNGKey(0)
    kx, kh, kp = jax.random.split(key, 3)

    xs = jax.random.normal(kx, (T, B, INPUT_SIZE), dtype=jnp.float32)
    hidden = jax.random.normal(kh, (B, HIDDEN_SIZE), dtype=jnp.float32)

    params, (w_ih, w_hh, bias) = init_rnn_cell_params(kp, INPUT_SIZE, HIDDEN_SIZE)

    # Pure-JAX references against the original (PyTorch-layout) weights.
    ref_cell = jnp.tanh(xs[0] @ w_ih.T + hidden @ w_hh.T + bias)
    h = hidden
    ref_steps = []
    for t in range(T):
        h = jnp.tanh(xs[t] @ w_ih.T + h @ w_hh.T + bias)
        ref_steps.append(h)
    ref_seq = jnp.stack(ref_steps, axis=0)

    # Single-cell kernel (exact module forward).
    out_cell = jax.block_until_ready(
        rnn_cell_forward(xs[0], hidden, params["w_ih_t"], params["w_hh_t"], params["bias"]))

    # Fused-sequence kernel (one launch, weights resident in VMEM, hidden in scratch).
    out_seq = jax.block_until_ready(
        rnn_sequence_forward(xs, hidden, params["w_ih_t"], params["w_hh_t"], params["bias"]))

    assert out_cell.shape == (B, HIDDEN_SIZE)
    assert out_seq.shape == (T, B, HIDDEN_SIZE)
    assert jnp.allclose(out_cell, ref_cell, atol=1e-5, rtol=1e-5)
    assert jnp.allclose(out_seq, ref_seq, atol=1e-4, rtol=1e-4)
    assert jnp.allclose(out_seq[0], out_cell, atol=1e-5, rtol=1e-5)

    print("KERNEL_OK")
</pallas_src>

<mosaic_0001>
module attributes {stable_mosaic.version = 11 : i64} {
  func.func @rnn_cell_kernel(%arg0: memref<8x64xf32, #tpu.memory_space<vmem>>, %arg1: memref<8x128xf32, #tpu.memory_space<vmem>>, %arg2: memref<64x128xf32, #tpu.memory_space<vmem>>, %arg3: memref<128x128xf32, #tpu.memory_space<vmem>>, %arg4: memref<1x128xf32, #tpu.memory_space<vmem>>, %arg5: memref<8x128xf32, #tpu.memory_space<vmem>>) attributes {dimension_semantics = [], scalar_prefetch = 0 : i64, scratch_operands = 0 : i64, tpu.core_type = #tpu.core_type<tc>} {
    %c0 = arith.constant 0 : index
    %c0_0 = arith.constant 0 : index
    %0 = vector.load %arg0[%c0, %c0_0] : memref<8x64xf32, #tpu.memory_space<vmem>>, vector<8x64xf32>
    %c0_1 = arith.constant 0 : index
    %c0_2 = arith.constant 0 : index
    %1 = vector.load %arg2[%c0_1, %c0_2] : memref<64x128xf32, #tpu.memory_space<vmem>>, vector<64x128xf32>
    %cst = arith.constant dense<0.000000e+00> : vector<8x128xf32>
    %2 = tpu.matmul %0, %1, %cst {dimension_numbers = #tpu.dot_dimension_numbers<[1], [0], [0], [1], [0, 0, 1, 1], [], []>} : vector<8x64xf32>, vector<64x128xf32>, vector<8x128xf32> -> vector<8x128xf32>
    %c0_3 = arith.constant 0 : index
    %c0_4 = arith.constant 0 : index
    %3 = vector.load %arg1[%c0_3, %c0_4] : memref<8x128xf32, #tpu.memory_space<vmem>>, vector<8x128xf32>
    %c0_5 = arith.constant 0 : index
    %c0_6 = arith.constant 0 : index
    %4 = vector.load %arg3[%c0_5, %c0_6] : memref<128x128xf32, #tpu.memory_space<vmem>>, vector<128x128xf32>
    %cst_7 = arith.constant dense<0.000000e+00> : vector<8x128xf32>
    %5 = tpu.matmul %3, %4, %cst_7 {dimension_numbers = #tpu.dot_dimension_numbers<[1], [0], [0], [1], [0, 0, 1, 1], [], []>} : vector<8x128xf32>, vector<128x128xf32>, vector<8x128xf32> -> vector<8x128xf32>
    %6 = arith.addf %2, %5 : vector<8x128xf32>
    %c0_8 = arith.constant 0 : index
    %c0_9 = arith.constant 0 : index
    %7 = vector.load %arg4[%c0_8, %c0_9] : memref<1x128xf32, #tpu.memory_space<vmem>>, vector<1x128xf32>
    %8 = vector.broadcast %7 : vector<1x128xf32> to vector<8x128xf32>
    %9 = arith.addf %6, %8 : vector<8x128xf32>
    %10 = math.tanh %9 : vector<8x128xf32>
    %c0_10 = arith.constant 0 : index
    %c0_11 = arith.constant 0 : index
    %11 = vector.load %arg5[%c0_10, %c0_11] : memref<8x128xf32, #tpu.memory_space<vmem>>, vector<8x128xf32>
    tpu.vector_store %arg5[%c0_10, %c0_11], %10 {strides = array<i32>} : memref<8x128xf32, #tpu.memory_space<vmem>>, vector<8x128xf32>,
    return
  }
}

</mosaic_0001>

<bundles_post_ra>
// kernel: rnn_cell_forward.1
= control target key start
LH: loop header
LB: loop body
LE: loop exit
PB: predicated region body
PF: predicated region fallthrough
CT: control target
= control target key end

     0   :  { %10 = vsyncpa [#allocation3], 0  ;;  %s590_s0 = inlined_call_operand.vmem [shape: f32[8,64], index: 0, kind: input, shape index: {}]   ;;  %s591_s1 = inlined_call_operand.hbm [shape: f32[8,128], index: 1, kind: input, shape index: {}, may-alias: {1,5}]   ;;  %s592_s2 = inlined_call_operand.hbm [shape: f32[64,128], index: 2, kind: input, shape index: {}]   ;;  %s593_s3 = inlined_call_operand.hbm [shape: f32[128,128], index: 3, kind: input, shape index: {}]   ;;  %s594_s4 = inlined_call_operand.vmem [shape: f32[1,128], index: 4, kind: input, shape index: {}]   ;;  %s595_s5 = inlined_call_operand.hbm [shape: f32[8,128], index: 5, kind: output, shape index: {}, may-alias: {1,5}]  }
   0x1   :  { %11 = vsyncpa [#allocation6], 0 }
   0x2   :  { %12 = vsyncpa [#allocation4], 0  ;;  %s479_s18 = smov [#allocation5]   ;;  %s385_s22 = scalar_lea.hbm %s592_s2, 1024 }
   0x3   :  { %s30_s19 = sshll.u32 %s479_s18, 4  ;;  %p386_p0 = scmp.ne.s32.totalorder %s592_s2, %s385_s22  ;;  %s31_s19 = int_to_ptr.vmem [resolvable:$true] %s30_s19 }
   0x4   :  { %p389_p1 = scmp.lt.u32.totalorder %s385_s22, %s592_s2 }
   0x6   :  { %p391_p2 = pnand %p389_p1, %p386_p0 }
   0x8   :  { %394 = shalt.err (!%p391_p2)
}
   0x9   :  { %s395_s27 = scalar_lea.vmem %s31_s19, 1024  ;;  %p400_p4 = scmp.lt.s32.totalorder %s31_s19, %s31_s19 }
   0xa   :  { %p396_p3 = scmp.ne.s32.totalorder %s31_s19, %s395_s27  ;;  %p401_p5 = scmp.lt.s32.totalorder %s395_s27, %s395_s27 }
   0xc   :  { %p402_p6 = por %p401_p5, %p400_p4 }
   0xe   :  { %p403_p7 = pnand %p402_p6, %p396_p3 }
  0x10   :  { %406 = shalt.err (!%p403_p7)
}
  0x11   :  { %s480_s28 = smov 128   ;;  %s481_s29 = smov 8  }
  0x12   :  { %36 = dma.hbm_to_vmem [thread:$0]  %s592_s2, 1024, %s31_s19, [#allocation6], %s480_s28, %s480_s28, %s481_s29  }
  0x13   :  { %s482_s7 = smov [#allocation2]   ;;  %s483_s9 = smov [#allocation7]  }
  0x14   :  { %s21_s8 = sshll.u32 %s482_s7, 4  ;;  %s42_s10 = sshll.u32 %s483_s9, 4  ;;  %s22_s8 = int_to_ptr.vmem [resolvable:$true] %s21_s8  ;;  %s43_s10 = int_to_ptr.vmem [resolvable:$true] %s42_s10 }
  0x15   :  { %s407_s13 = scalar_lea.hbm %s591_s1, 128 }
  0x16   :  { %p408_p8 = scmp.ne.s32.totalorder %s591_s1, %s407_s13  ;;  %p411_p9 = scmp.lt.u32.totalorder %s407_s13, %s591_s1 }
  0x18   :  { %p413_p10 = pnand %p411_p9, %p408_p8 }
  0x1a   :  { %416 = shalt.err (!%p413_p10)
}
  0x1b   :  { %s417_s2 = scalar_lea.vmem %s22_s8, 128  ;;  %p422_p12 = scmp.lt.s32.totalorder %s22_s8, %s22_s8 }
  0x1c   :  { %p418_p11 = scmp.ne.s32.totalorder %s22_s8, %s417_s2  ;;  %p423_p13 = scmp.lt.s32.totalorder %s417_s2, %s417_s2 }
  0x1e   :  { %p424_p0 = por %p423_p13, %p422_p12 }
  0x20   :  { %p425_p1 = pnand %p424_p0, %p418_p11 }
  0x22   :  { %428 = shalt.err (!%p425_p1)
}
  0x23   :  { %24 = dma.hbm_to_vmem [thread:$0]  %s591_s1, 128, %s22_s8, [#allocation3]  }
  0x24   :  { %s429_s22 = scalar_lea.hbm %s593_s3, 2048 }
  0x25   :  { %p430_p2 = scmp.ne.s32.totalorder %s593_s3, %s429_s22  ;;  %p433_p3 = scmp.lt.u32.totalorder %s429_s22, %s593_s3 }
  0x27   :  { %p435_p4 = pnand %p433_p3, %p430_p2 }
  0x29   :  { %438 = shalt.err (!%p435_p4)
}
  0x2a   :  { %s439_s27 = scalar_lea.vmem %s43_s10, 2048  ;;  %p444_p6 = scmp.lt.s32.totalorder %s43_s10, %s43_s10 }
  0x2b   :  { %p440_p5 = scmp.ne.s32.totalorder %s43_s10, %s439_s27  ;;  %p445_p7 = scmp.lt.s32.totalorder %s439_s27, %s439_s27 }
  0x2d   :  { %p446_p8 = por %p445_p7, %p444_p6 }
  0x2f   :  { %p447_p9 = pnand %p446_p8, %p440_p5 }
  0x31   :  { %450 = shalt.err (!%p447_p9)
}
  0x32   :  { %48 = dma.hbm_to_vmem [thread:$0]  %s593_s3, 2048, %s43_s10, [#allocation6], %s480_s28, %s480_s28, %s481_s29  }
  0x33   :  { %473 = dma.done.wait [#allocation3], 128  }
  0x34   :  { %474 = vsyncadd [#allocation3], 4294967168 }
  0x35   :  { %475 = dma.done.wait [#allocation6], 3072  }
  0x36   :  { %476 = vsyncadd [#allocation6], 4294964224  ;;  %v484_v0 = vmov 0.0|0.0   ;;  %vm485_vm0 = vmmov 0   ;;  %v486_v1 = vmov 0.0   ;;  %v70_v2 = vld [vmem:[#allocation7] sm:$0xff] }
  0x37   :  { %338 = vmatprep.subr.bf16.mxu0 %v484_v0  ;;  %362 = vmatprep.subr.bf16.mxu1 %v484_v0  ;;  %v71_v3 = vld [vmem:[#allocation7 + $0x8] sm:$0xff]  ;;  %v72_v4 = vld [vmem:[#allocation7 + $0x10] sm:$0xff]  ;;  %v73_v6 = vld [vmem:[#allocation7 + $0x18] sm:$0xff]  ;;  %vm156_vm1 = vcmask 523264   ;;  %s487_s6 = smov [#allocation8]  }
  0x38   :  { %335 = vmatprep.mubr.msk.f32.mxu1 %vm485_vm0, %v486_v1  ;;  %316 = vmatprep.mubr.msk.f32.mxu0 %vm485_vm0, %v486_v1  ;;  %v339_v5 = vpack.c.bf16 %v71_v3, %v70_v2  ;;  %v61_v7 = vld [vmem:[#allocation5] sm:$0xff]  ;;  %v342_v8 = vpack.c.bf16 %v73_v6, %v72_v4  ;;  %v62_v10 = vld [vmem:[#allocation5 + $0x8] sm:$0xff]  ;;  %v63_v13 = vld [vmem:[#allocation5 + $0x10] sm:$0xff]  ;;  %s246_s7 = sshll.u32 %s487_s6, 4  ;;  %s247_s7 = int_to_ptr.vmem [resolvable:$true] %s246_s7 }
  0x39   :  { %v74_v9 = vld [vmem:[#allocation7 + $0x20] sm:$0xff]  ;;  %v75_v11 = vld [vmem:[#allocation7 + $0x28] sm:$0xff]  ;;  %v363_v12 = vpack.c.bf16 %v62_v10, %v61_v7  ;;  %v64_v14 = vld [vmem:[#allocation5 + $0x18] sm:$0xff]  ;;  %s451_s8 = scalar_lea.vmem %s247_s7, 128  ;;  %p456_p11 = scmp.lt.s32.totalorder %s247_s7, %s247_s7 }
  0x3a   :  { %340 = vmatpush3.bf16.msra.mxu0 %v339_v5  ;;  %v366_v15 = vpack.c.bf16 %v64_v14, %v63_v13  ;;  %v345_v16 = vpack.c.bf16 %v75_v11, %v74_v9  ;;  %v65_v17 = vld [vmem:[#allocation5 + $0x20] sm:$0xff]  ;;  %v66_v18 = vld [vmem:[#allocation5 + $0x28] sm:$0xff]  ;;  %v76_v19 = vld [vmem:[#allocation7 + $0x30] sm:$0xff]  ;;  %p452_p10 = scmp.ne.s32.totalorder %s247_s7, %s451_s8  ;;  %p457_p12 = scmp.lt.s32.totalorder %s451_s8, %s451_s8 }
  0x3b   :  { %341 = vmatprep.subr.bf16.mxu0 %v484_v0  ;;  %364 = vmatpush3.bf16.msra.mxu1 %v363_v12  ;;  %v77_v20 = vld [vmem:[#allocation7 + $0x38] sm:$0xff]  ;;  %v369_v21 = vpack.c.bf16 %v66_v18, %v65_v17  ;;  %v67_v23 = vld [vmem:[#allocation5 + $0x30] sm:$0xff]  ;;  %v78_v25 = vld [vmem:[#allocation7 + $0x40] sm:$0xff] }
  0x3c   :  { %365 = vmatprep.subr.bf16.mxu1 %v484_v0  ;;  %v348_v22 = vpack.c.bf16 %v77_v20, %v76_v19  ;;  %v68_v24 = vld [vmem:[#allocation5 + $0x38] sm:$0xff]  ;;  %v79_v26 = vld [vmem:[#allocation7 + $0x48] sm:$0xff]  ;;  %v80_v29 = vld [vmem:[#allocation7 + $0x50] sm:$0xff]  ;;  %p458_p13 = por %p457_p12, %p456_p11 }
  0x3d   :  { %v372_v27 = vpack.c.bf16 %v68_v24, %v67_v23  ;;  %v351_v28 = vpack.c.bf16 %v79_v26, %v78_v25  ;;  %v81_v30 = vld [vmem:[#allocation7 + $0x58] sm:$0xff]  ;;  %v82_v33 = vld [vmem:[#allocation7 + $0x60] sm:$0xff]  ;;  %v83_v34 = vld [vmem:[#allocation7 + $0x68] sm:$0xff] }
  0x3e   :  { %343 = vmatpush3.bf16.msra.mxu0 %v342_v8  ;;  %v60_v31 = vld [vmem:[%s590_s0] sm:$0xff]  ;;  %v354_v32 = vpack.c.bf16 %v81_v30, %v80_v29  ;;  %v357_v35 = vpack.c.bf16 %v83_v34, %v82_v33  ;;  %v84_v36 = vld [vmem:[#allocation7 + $0x70] sm:$0xff]  ;;  %p459_p0 = pnand %p458_p13, %p452_p10 }
  0x3f   :  { %344 = vmatprep.subr.bf16.mxu0 %v484_v0  ;;  %367 = vmatpush3.bf16.msra.mxu1 %v366_v15  ;;  %v85_v37 = vld [vmem:[#allocation7 + $0x78] sm:$0xff] }
  0x40   :  { %368 = vmatprep.subr.bf16.mxu1 %v484_v0  ;;  %v360_v38 = vpack.c.bf16 %v85_v37, %v84_v36  ;;  %v69_v39 = vld [vmem:[#allocation2] sm:$0xff] }
  0x41   :  { %v257_v43 = vld [vmem:[%s594_s4] ss:$0 sm:$0xff] }
  0x42   :  { %346 = vmatpush3.bf16.msra.mxu0 %v345_v16 }
  0x43   :  { %347 = vmatprep.subr.bf16.mxu0 %v484_v0  ;;  %370 = vmatpush3.bf16.msra.mxu1 %v369_v21 }
  0x44   :  { %371 = vmatprep.subr.bf16.mxu1 %v484_v0 }
  0x46   :  { %349 = vmatpush3.bf16.msra.mxu0 %v348_v22 }
  0x47   :  { %350 = vmatprep.subr.bf16.mxu0 %v484_v0  ;;  %373 = vmatpush3.bf16.msra.mxu1 %v372_v27 }
  0x4a   :  { %352 = vmatpush3.bf16.msra.mxu0 %v351_v28  ;;  %336 = vmatmul.mubr.msk.f32.vlgmr.msra.gmra.mrb[0].mxu1 %vm156_vm1, %v60_v31 }
  0x4b   :  { %353 = vmatprep.subr.bf16.mxu0 %v484_v0 }
  0x4e   :  { %355 = vmatpush3.bf16.msra.mxu0 %v354_v32 }
  0x4f   :  { %356 = vmatprep.subr.bf16.mxu0 %v484_v0 }
  0x52   :  { %358 = vmatpush3.bf16.msra.mxu0 %v357_v35 }
  0x53   :  { %359 = vmatprep.subr.bf16.mxu0 %v484_v0 }
  0x56   :  { %361 = vmatpush3.bf16.msra.mxu0 %v360_v38 }
  0x59   :  { %317 = vmatmul.mubr.f32.vlgmr.msra.gmra.mrb[0].mxu0 %v69_v39 }
 0x11d   :  { %v226_v40 = vpop.f32.mrb[0].mxu1 }
 0x11e   :  { %v337_v41 = vpop.f32.mrb[1].mxu1 }
 0x12c   :  { %v152_v42 = vpop.f32.mrb[0].mxu0 }
 0x12d   :  { %v227_v44 = vadd.f32 %v226_v40, %v152_v42  ;;  %v318_v45 = vpop.f32.mrb[1].mxu0 }
 0x12f   :  { %v237_v46 = vadd.f32 %v257_v43, %v227_v44 }
 0x131   :  { %383 = vtanh.f32 %v237_v46 }
 0x13b   :  { %v384_v47 = vpop.eup %383 }
 0x13c   :  { %239 = vst [vmem:[#allocation8] sm:$0xff] %v384_v47 }
 0x13d   :  { %462 = shalt.err (!%p459_p0)
}
 0x13e   :  { %s463_s4 = scalar_lea.hbm %s595_s5, 128 }
 0x13f   :  { %p464_p1 = scmp.ne.s32.totalorder %s595_s5, %s463_s4  ;;  %p467_p2 = scmp.lt.u32.totalorder %s463_s4, %s595_s5 }
 0x141   :  { %p469_p3 = pnand %p467_p2, %p464_p1 }
 0x143   :  { %472 = shalt.err (!%p469_p3)
}
 0x144   :  { %249 = dma.vmem_to_hbm [thread:$0]  %s247_s7, 128, %s595_s5, [#allocation4]  }
 0x145   :  { %477 = dma.done.wait [#allocation4], 128  }
 0x146   :  { %478 = vsyncadd [#allocation4], 4294967168 }
 0x147   :  { %253 = vsyncpa [#allocation3], 1 }
 0x148   :  { %254 = vsyncpa [#allocation6], 1 }
 0x149   :  { %255 = vsyncpa [#allocation4], 1 }

</bundles_post_ra>
